<compile_context>
chip_gen: v5e
topology: v5e:2x2
jax: 0.10.0
libtpu: 0.0.40
codegen_flags: <defaults>
</compile_context>

<pallas_src>
import functools

import jax
import jax.numpy as jnp
from jax.experimental import pallas as pl
from jax.experimental.pallas import tpu as pltpu


def _round_up(x, m):
    return (x + m - 1) // m * m


# ---------------------------------------------------------------------------
# Pass 1: conv as tiled im2col GEMM (row tiles x K-reduction axis) with fused
# per-row-tile BN partial statistics computed from the f32 accumulator.
# ---------------------------------------------------------------------------
def _conv_stats_kernel(p_ref, w_ref, y_ref, st_ref, acc_ref):
    # p_ref : (TM, TK)    bf16 im2col patch rows (zero rows/cols for padding)
    # w_ref : (TK, Cp)    bf16 weight chunk, Cout zero-padded to Cp (lane dense)
    # y_ref : (TM, Cp)    conv output tile (bf16 by default)
    # st_ref: (1, 2, Cp)  f32 per-tile partials (row 0 = sum, row 1 = sum of sq)
    # acc_ref:(TM, Cp)    f32 accumulator scratch, persists across the K axis
    k = pl.program_id(1)

    @pl.when(k == 0)
    def _():
        acc_ref[...] = jnp.zeros_like(acc_ref)

    acc_ref[...] += jnp.dot(p_ref[...], w_ref[...],
                            preferred_element_type=jnp.float32)

    @pl.when(k == pl.num_programs(1) - 1)
    def _():
        acc = acc_ref[...]
        y_ref[...] = acc.astype(y_ref.dtype)
        # BN partials from the f32 accumulator (NOT the bf16-stored values).
        ssum = jnp.sum(acc, axis=0, keepdims=True)        # (1, Cp)
        ssq = jnp.sum(acc * acc, axis=0, keepdims=True)   # (1, Cp)
        st_ref[...] = jnp.concatenate([ssum, ssq], axis=0).reshape(st_ref.shape)


# ---------------------------------------------------------------------------
# Pass 2: y * scale + shift, ReLU  (scale/shift = folded BN affine, O(Cout)
# precompute in the wrapper; big lane-dense row tiles, purely mem-bound).
# ---------------------------------------------------------------------------
def _bn_relu_kernel(y_ref, scale_ref, shift_ref, o_ref):
    y = y_ref[...].astype(jnp.float32)
    o_ref[...] = jnp.maximum(y * scale_ref[...] + shift_ref[...],
                             0.0).astype(o_ref.dtype)


@functools.partial(
    jax.jit,
    static_argnames=("stride", "padding", "groups", "eps", "compute_dtype",
                     "inter_dtype", "out_dtype", "out_layout"))
def conv_bn_relu(x_nchw, weight_oihw, gamma, beta, *, stride=1, padding=0,
                 groups=1, eps=1e-5, compute_dtype=jnp.bfloat16,
                 inter_dtype=jnp.bfloat16, out_dtype=jnp.float32,
                 out_layout="NCHW"):
    """x_nchw: (N, Cin, H, W); weight_oihw: (Cout, Cin, KH, KW)."""
    if groups != 1:
        # TODO(synk): grouped convolution not implemented in the Pallas kernel.
        raise NotImplementedError("kernel supports groups=1 only")

    N, Cin, H, W = x_nchw.shape
    Cout, _, KH, KW = weight_oihw.shape
    Ho = (H + 2 * padding - KH) // stride + 1
    Wo = (W + 2 * padding - KW) // stride + 1
    M = N * Ho * Wo                       # output rows (pixels)
    K = KH * KW * Cin                     # GEMM contraction dim

    # --- lane/sublane-aligned padded dims ------------------------------------
    Cp = _round_up(Cout, 256) if Cout >= 256 else _round_up(Cout, 128)
    TK = min(_round_up(K, 128), 1024)     # contraction tile (multiple of 128)
    Kp = _round_up(K, TK)
    nk = Kp // TK

    inter_bytes = jnp.dtype(inter_dtype).itemsize
    out_bytes = jnp.dtype(out_dtype).itemsize

    # --- VMEM-aware tile sizing (v7x: 64 MiB physical, v5e/v6e: 128 MiB) -----
    try:
        vmem_cap = int(pltpu.get_tpu_info().vmem_capacity_bytes)
    except Exception:
        vmem_cap = 64 * 1024 * 1024
    budget = vmem_cap // 3                # double-buffered working-set budget
    vmem_limit = min(3 * vmem_cap // 4, 112 * 1024 * 1024)

    TM1 = 128
    for cand in (256, 512, 1024, 2048):
        work = (2 * cand * TK * 2               # patches (bf16, 2x buffered)
                + 2 * TK * Cp * 2               # weight chunk (bf16, 2x buffered)
                + 2 * cand * Cp * inter_bytes   # y writeback (2x buffered)
                + cand * Cp * 4                 # f32 accumulator scratch
                + 4 * 2 * Cp * 4)               # stats
        if work <= budget:
            TM1 = cand
    while TM1 > 128 and _round_up(M, TM1) // TM1 < 2:  # >=2 tiles for megacore
        TM1 //= 2

    TM2 = TM1                              # pass 2 is mem-bound: go bigger
    for cand in (256, 512, 1024, 2048):
        work = 2 * cand * Cp * (inter_bytes + out_bytes) + 4 * Cp * 4
        if cand >= TM1 and work <= budget:
            TM2 = cand
    while TM2 > TM1 and _round_up(M, TM2) // TM2 < 2:
        TM2 //= 2

    Mp = _round_up(M, TM2)                 # TM1 | TM2 | Mp (all powers of two)
    nt1 = Mp // TM1
    nt2 = Mp // TM2

    # --- layout plumbing (fused into XLA fusions under jit) ------------------
    # TODO(synk): for Cin >~ 128, replace the materialized im2col patches with an
    # in-kernel tap loop (grid axis over KH*KW taps with a shifted-window
    # index_map) to avoid the KH*KW x HBM read amplification.
    x_nhwc = jnp.transpose(x_nchw, (0, 2, 3, 1))
    if padding:
        x_nhwc = jnp.pad(
            x_nhwc, ((0, 0), (padding, padding), (padding, padding), (0, 0)))
    taps = []
    for kh in range(KH):
        for kw in range(KW):
            taps.append(x_nhwc[:, kh:kh + stride * (Ho - 1) + 1:stride,
                               kw:kw + stride * (Wo - 1) + 1:stride, :])
    patches = jnp.concatenate(taps, axis=-1).reshape(M, K).astype(compute_dtype)
    patches = jnp.pad(patches, ((0, Mp - M), (0, Kp - K)))

    w_kc = jnp.transpose(weight_oihw, (2, 3, 1, 0)).reshape(K, Cout)
    w_kc = jnp.pad(w_kc, ((0, Kp - K), (0, Cp - Cout))).astype(compute_dtype)

    # --- pass 1: tiled GEMM + fused per-tile BN partial statistics -----------
    cost1 = pl.CostEstimate(
        flops=2 * Mp * Kp * Cp,
        transcendentals=0,
        bytes_accessed=(Mp * Kp * 2 + nt1 * Kp * Cp * 2
                        + Mp * Cp * inter_bytes + nt1 * 2 * Cp * 4))
    y_conv, stats = pl.pallas_call(
        _conv_stats_kernel,
        out_shape=(jax.ShapeDtypeStruct((Mp, Cp), inter_dtype),
                   jax.ShapeDtypeStruct((nt1, 2, Cp), jnp.float32)),
        grid=(nt1, nk),
        in_specs=[pl.BlockSpec((TM1, TK), lambda i, k: (i, k)),
                  pl.BlockSpec((TK, Cp), lambda i, k: (k, 0))],
        out_specs=(pl.BlockSpec((TM1, Cp), lambda i, k: (i, 0)),
                   pl.BlockSpec((1, 2, Cp), lambda i, k: (i, 0, 0))),
        scratch_shapes=[pltpu.VMEM((TM1, Cp), jnp.float32)],
        compiler_params=pltpu.CompilerParams(
            dimension_semantics=("parallel", "arbitrary"),
            vmem_limit_bytes=vmem_limit),
        cost_estimate=cost1,
    )(patches, w_kc)

    # --- fold batch stats into per-channel scale/shift (O(Cout) XLA glue) ----
    inv_count = 1.0 / M
    ch_sum = jnp.sum(stats[:, 0, :], axis=0)             # (Cp,)
    ch_sumsq = jnp.sum(stats[:, 1, :], axis=0)           # (Cp,)
    mean = ch_sum * inv_count
    # NOTE: E[x^2]-E[x]^2 in f32; for very large M / non-centered activations a
    # Welford-style combination of per-tile partials would be more robust.
    var = jnp.maximum(ch_sumsq * inv_count - mean * mean, 0.0)
    inv_std = jax.lax.rsqrt(var + eps)
    gamma_p = jnp.pad(gamma.astype(jnp.float32), (0, Cp - Cout))
    beta_p = jnp.pad(beta.astype(jnp.float32), (0, Cp - Cout))
    scale = (gamma_p * inv_std).reshape(1, Cp)
    shift = (beta_p - mean * gamma_p * inv_std).reshape(1, Cp)

    # --- pass 2: normalize + ReLU over big lane-dense row tiles --------------
    cost2 = pl.CostEstimate(
        flops=3 * Mp * Cp,
        transcendentals=0,
        bytes_accessed=Mp * Cp * (inter_bytes + out_bytes) + 2 * Cp * 4 * nt2)
    # TODO(synk): when out_dtype == inter_dtype, donate y_conv via
    # input_output_aliases={0: 0} to drop one Mp x Cp HBM buffer.
    y = pl.pallas_call(
        _bn_relu_kernel,
        out_shape=jax.ShapeDtypeStruct((Mp, Cp), out_dtype),
        grid=(nt2,),
        in_specs=[pl.BlockSpec((TM2, Cp), lambda i: (i, 0)),
                  pl.BlockSpec((1, Cp), lambda i: (0, 0)),
                  pl.BlockSpec((1, Cp), lambda i: (0, 0))],
        out_specs=pl.BlockSpec((TM2, Cp), lambda i: (i, 0)),
        compiler_params=pltpu.CompilerParams(
            dimension_semantics=("parallel",),
            vmem_limit_bytes=vmem_limit),
        cost_estimate=cost2,
    )(y_conv, scale, shift)

    out = y[:M, :Cout].reshape(N, Ho, Wo, Cout)
    if out_layout == "NHWC":
        return out                         # skip the NCHW round-trip entirely
    return jnp.transpose(out, (0, 3, 1, 2))


def _reference(x_nchw, weight_oihw, gamma, beta, *, stride=1, padding=0,
               eps=1e-5, compute_dtype=jnp.bfloat16):
    """Plain-JAX reference mirroring the kernel's MXU numerics (bf16 conv inputs,
    f32 accumulation), then f32 training-mode BN (biased batch var) + ReLU."""
    y = jax.lax.conv_general_dilated(
        x_nchw.astype(compute_dtype), weight_oihw.astype(compute_dtype),
        window_strides=(stride, stride),
        padding=[(padding, padding), (padding, padding)],
        dimension_numbers=("NCHW", "OIHW", "NCHW"),
        preferred_element_type=jnp.float32)
    mean = jnp.mean(y, axis=(0, 2, 3), keepdims=True)
    var = jnp.mean((y - mean) ** 2, axis=(0, 2, 3), keepdims=True)
    y = (y - mean) * jax.lax.rsqrt(var + eps)
    y = y * gamma.reshape(1, -1, 1, 1) + beta.reshape(1, -1, 1, 1)
    return jnp.maximum(y, 0.0)


if __name__ == "__main__":
    # Small shapes consistent with the module: batch=2, in_ch=4, out_ch=8,
    # 16x16 spatial, kernel_size=3, stride=1, padding=0 (module defaults).
    key = jax.random.PRNGKey(0)
    k_x, k_w = jax.random.split(key)

    N, Cin, H, W = 2, 4, 16, 16
    Cout, KH, KW = 8, 3, 3
    padding = 0

    x = jax.random.normal(k_x, (N, Cin, H, W), dtype=jnp.float32)
    # Conv2d bias=False weight; BatchNorm2d default init: weight=1, bias=0.
    weight = jax.random.normal(k_w, (Cout, Cin, KH, KW), dtype=jnp.float32) * 0.1
    gamma = jnp.ones((Cout,), dtype=jnp.float32)
    beta = jnp.zeros((Cout,), dtype=jnp.float32)

    out = conv_bn_relu(x, weight, gamma, beta, stride=1, padding=padding, groups=1)
    out = jax.block_until_ready(out)

    ref = _reference(x, weight, gamma, beta, stride=1, padding=padding)
    assert out.shape == ref.shape, (out.shape, ref.shape)
    # Tolerance covers the bf16 storage of the conv intermediate (BN is applied
    # to bf16-rounded activations; stats come from the f32 accumulator).
    max_err = float(jnp.max(jnp.abs(out - ref)))
    assert max_err < 2e-2, max_err

    print("KERNEL_OK")
</pallas_src>

<mosaic_0001>
module attributes {stable_mosaic.version = 11 : i64} {
  func.func @_conv_stats_kernel(%arg0: i32, %arg1: i32, %arg2: memref<256x128xbf16, #tpu.memory_space<vmem>>, %arg3: memref<128x128xbf16, #tpu.memory_space<vmem>>, %arg4: memref<256x128xbf16, #tpu.memory_space<vmem>>, %arg5: memref<1x2x128xf32, #tpu.memory_space<vmem>>, %arg6: memref<256x128xf32, #tpu.memory_space<vmem>>) attributes {dimension_semantics = [#tpu.dimension_semantics<parallel>, #tpu.dimension_semantics<arbitrary>], iteration_bounds = array<i64: 2, 1>, scalar_prefetch = 0 : i64, scratch_operands = 1 : i64, tpu.core_type = #tpu.core_type<tc>, window_params = [{transform_indices = @transform_0, window_bounds = array<i64: 256, 128>}, {transform_indices = @transform_1, window_bounds = array<i64: 128, 128>}, {transform_indices = @transform_2, window_bounds = array<i64: 256, 128>}, {transform_indices = @transform_3, window_bounds = array<i64: 1, 2, 128>}]} {
    %c0_i32 = arith.constant 0 : i32
    %0 = arith.cmpi eq, %arg1, %c0_i32 : i32
    %1 = arith.extui %0 : i1 to i32
    %c0_i32_0 = arith.constant 0 : i32
    %2 = arith.cmpi ne, %1, %c0_i32_0 : i32
    scf.if %2 {
      %cst_10 = arith.constant 0.000000e+00 : f32
      %12 = vector.broadcast %cst_10 : f32 to vector<256x128xf32>
      %c0_11 = arith.constant 0 : index
      %c0_12 = arith.constant 0 : index
      %13 = vector.load %arg6[%c0_11, %c0_12] : memref<256x128xf32, #tpu.memory_space<vmem>>, vector<256x128xf32>
      tpu.vector_store %arg6[%c0_11, %c0_12], %12 {strides = array<i32>} : memref<256x128xf32, #tpu.memory_space<vmem>>, vector<256x128xf32>,
    } else {
    }
    %c0 = arith.constant 0 : index
    %c0_1 = arith.constant 0 : index
    %3 = vector.load %arg6[%c0, %c0_1] : memref<256x128xf32, #tpu.memory_space<vmem>>, vector<256x128xf32>
    %c0_2 = arith.constant 0 : index
    %c0_3 = arith.constant 0 : index
    %4 = vector.load %arg2[%c0_2, %c0_3] : memref<256x128xbf16, #tpu.memory_space<vmem>>, vector<256x128xbf16>
    %c0_4 = arith.constant 0 : index
    %c0_5 = arith.constant 0 : index
    %5 = vector.load %arg3[%c0_4, %c0_5] : memref<128x128xbf16, #tpu.memory_space<vmem>>, vector<128x128xbf16>
    %cst = arith.constant dense<0.000000e+00> : vector<256x128xf32>
    %6 = tpu.matmul %4, %5, %cst {dimension_numbers = #tpu.dot_dimension_numbers<[1], [0], [0], [1], [0, 0, 1, 1], [], []>} : vector<256x128xbf16>, vector<128x128xbf16>, vector<256x128xf32> -> vector<256x128xf32>
    %7 = arith.addf %3, %6 : vector<256x128xf32>
    %c0_6 = arith.constant 0 : index
    %c0_7 = arith.constant 0 : index
    %8 = vector.load %arg6[%c0_6, %c0_7] : memref<256x128xf32, #tpu.memory_space<vmem>>, vector<256x128xf32>
    tpu.vector_store %arg6[%c0_6, %c0_7], %7 {strides = array<i32>} : memref<256x128xf32, #tpu.memory_space<vmem>>, vector<256x128xf32>,
    %c0_i32_8 = arith.constant 0 : i32
    %9 = arith.cmpi eq, %arg1, %c0_i32_8 : i32
    %10 = arith.extui %9 : i1 to i32
    %c0_i32_9 = arith.constant 0 : i32
    %11 = arith.cmpi ne, %10, %c0_i32_9 : i32
    scf.if %11 {
      %c0_10 = arith.constant 0 : index
      %c0_11 = arith.constant 0 : index
      %12 = vector.load %arg6[%c0_10, %c0_11] : memref<256x128xf32, #tpu.memory_space<vmem>>, vector<256x128xf32>
      %13 = arith.truncf %12 : vector<256x128xf32> to vector<256x128xbf16>
      %c0_12 = arith.constant 0 : index
      %c0_13 = arith.constant 0 : index
      %14 = vector.load %arg4[%c0_12, %c0_13] : memref<256x128xbf16, #tpu.memory_space<vmem>>, vector<256x128xbf16>
      tpu.vector_store %arg4[%c0_12, %c0_13], %13 {strides = array<i32>} : memref<256x128xbf16, #tpu.memory_space<vmem>>, vector<256x128xbf16>,
      %cst_14 = arith.constant dense<0.000000e+00> : vector<128xf32>
      %15 = vector.multi_reduction <add>, %12, %cst_14 [0] : vector<256x128xf32> to vector<128xf32>
      %16 = vector.shape_cast %15 : vector<128xf32> to vector<1x128xf32>
      %17 = arith.mulf %12, %12 : vector<256x128xf32>
      %cst_15 = arith.constant dense<0.000000e+00> : vector<128xf32>
      %18 = vector.multi_reduction <add>, %17, %cst_15 [0] : vector<256x128xf32> to vector<128xf32>
      %19 = vector.shape_cast %18 : vector<128xf32> to vector<1x128xf32>
      %20 = tpu.concatenate %16, %19 in 0 : vector<1x128xf32>, vector<1x128xf32> -> vector<2x128xf32>
      %21 = vector.shape_cast %20 : vector<2x128xf32> to vector<1x2x128xf32>
      %c0_16 = arith.constant 0 : index
      %c0_17 = arith.constant 0 : index
      %c0_18 = arith.constant 0 : index
      %22 = vector.load %arg5[%c0_16, %c0_17, %c0_18] : memref<1x2x128xf32, #tpu.memory_space<vmem>>, vector<1x2x128xf32>
      tpu.vector_store %arg5[%c0_16, %c0_17, %c0_18], %21 {strides = array<i32>} : memref<1x2x128xf32, #tpu.memory_space<vmem>>, vector<1x2x128xf32>,
    } else {
    }
    return
  }
  func.func @transform_0(%arg0: i32, %arg1: i32) -> (i32, i32) {
    %c0_i32 = arith.constant 0 : i32
    return %arg0, %arg1 : i32, i32
  }
  func.func @transform_1(%arg0: i32, %arg1: i32) -> (i32, i32) {
    %c0_i32 = arith.constant 0 : i32
    %c0_i32_0 = arith.constant 0 : i32
    return %arg1, %c0_i32 : i32, i32
  }
  func.func @transform_2(%arg0: i32, %arg1: i32) -> (i32, i32) {
    %c0_i32 = arith.constant 0 : i32
    %c0_i32_0 = arith.constant 0 : i32
    return %arg0, %c0_i32 : i32, i32
  }
  func.func @transform_3(%arg0: i32, %arg1: i32) -> (i32, i32, i32) {
    %c0_i32 = arith.constant 0 : i32
    %c0_i32_0 = arith.constant 0 : i32
    %c0_i32_1 = arith.constant 0 : i32
    return %arg0, %c0_i32, %c0_i32_0 : i32, i32, i32
  }
}

module attributes {stable_mosaic.version = 11 : i64} {
  func.func @_bn_relu_kernel(%arg0: i32, %arg1: memref<256x128xbf16, #tpu.memory_space<vmem>>, %arg2: memref<1x128xf32, #tpu.memory_space<vmem>>, %arg3: memref<1x128xf32, #tpu.memory_space<vmem>>, %arg4: memref<256x128xf32, #tpu.memory_space<vmem>>) attributes {dimension_semantics = [#tpu.dimension_semantics<parallel>], iteration_bounds = array<i64: 2>, scalar_prefetch = 0 : i64, scratch_operands = 0 : i64, tpu.core_type = #tpu.core_type<tc>, window_params = [{transform_indices = @transform_0, window_bounds = array<i64: 256, 128>}, {pipeline_mode = #tpu.pipeline_mode<synchronous>, transform_indices = @transform_1, window_bounds = array<i64: 1, 128>}, {pipeline_mode = #tpu.pipeline_mode<synchronous>, transform_indices = @transform_2, window_bounds = array<i64: 1, 128>}, {transform_indices = @transform_3, window_bounds = array<i64: 256, 128>}]} {
    %c0 = arith.constant 0 : index
    %c0_0 = arith.constant 0 : index
    %0 = vector.load %arg1[%c0, %c0_0] : memref<256x128xbf16, #tpu.memory_space<vmem>>, vector<256x128xbf16>
    %1 = arith.extf %0 : vector<256x128xbf16> to vector<256x128xf32>
    %c0_1 = arith.constant 0 : index
    %c0_2 = arith.constant 0 : index
    %2 = vector.load %arg2[%c0_1, %c0_2] : memref<1x128xf32, #tpu.memory_space<vmem>>, vector<1x128xf32>
    %3 = vector.broadcast %2 : vector<1x128xf32> to vector<256x128xf32>
    %4 = arith.mulf %1, %3 : vector<256x128xf32>
    %c0_3 = arith.constant 0 : index
    %c0_4 = arith.constant 0 : index
    %5 = vector.load %arg3[%c0_3, %c0_4] : memref<1x128xf32, #tpu.memory_space<vmem>>, vector<1x128xf32>
    %6 = vector.broadcast %5 : vector<1x128xf32> to vector<256x128xf32>
    %7 = arith.addf %4, %6 : vector<256x128xf32>
    %cst = arith.constant 0.000000e+00 : f32
    %8 = vector.broadcast %cst : f32 to vector<256x128xf32>
    %9 = arith.maximumf %7, %8 : vector<256x128xf32>
    %c0_5 = arith.constant 0 : index
    %c0_6 = arith.constant 0 : index
    %10 = vector.load %arg4[%c0_5, %c0_6] : memref<256x128xf32, #tpu.memory_space<vmem>>, vector<256x128xf32>
    tpu.vector_store %arg4[%c0_5, %c0_6], %9 {strides = array<i32>} : memref<256x128xf32, #tpu.memory_space<vmem>>, vector<256x128xf32>,
    return
  }
  func.func @transform_0(%arg0: i32) -> (i32, i32) {
    %c0_i32 = arith.constant 0 : i32
    %c0_i32_0 = arith.constant 0 : i32
    return %arg0, %c0_i32 : i32, i32
  }
  func.func @transform_1(%arg0: i32) -> (i32, i32) {
    %c0_i32 = arith.constant 0 : i32
    %c0_i32_0 = arith.constant 0 : i32
    %c0_i32_1 = arith.constant 0 : i32
    return %c0_i32, %c0_i32_0 : i32, i32
  }
  func.func @transform_2(%arg0: i32) -> (i32, i32) {
    %c0_i32 = arith.constant 0 : i32
    %c0_i32_0 = arith.constant 0 : i32
    %c0_i32_1 = arith.constant 0 : i32
    return %c0_i32, %c0_i32_0 : i32, i32
  }
  func.func @transform_3(%arg0: i32) -> (i32, i32) {
    %c0_i32 = arith.constant 0 : i32
    %c0_i32_0 = arith.constant 0 : i32
    return %arg0, %c0_i32 : i32, i32
  }
}

</mosaic_0001>

<bundles_post_ra>
// kernel: conv_bn_relu.3
= control target key start
LH: loop header
LB: loop body
LE: loop exit
PB: predicated region body
PF: predicated region fallthrough
CT: control target
= control target key end

     0   :  { %s558_s12 = smov 0   ;;  %s705_s0 = inlined_call_operand.vmem [shape: bf16[512,128], index: 0, kind: input, shape index: {}]   ;;  %s706_s1 = inlined_call_operand.vmem [shape: f32[1,128], index: 1, kind: input, shape index: {}]   ;;  %s707_s2 = inlined_call_operand.vmem [shape: f32[1,128], index: 2, kind: input, shape index: {}]   ;;  %s708_s3 = inlined_call_operand.vmem [shape: f32[512,128], index: 3, kind: output, shape index: {}]  }
   0x1 LB: > { %s430_s13 = sadd.s32 4294967295, %s536_s12   ;;  %p434_p0 = scmp.ge.s32.totalorder %s536_s12, 1  ;;  %s536_s12 = sphi %s558_s12, %s13_s12  }
   0x2   : > { %p138_p1 = scmp.lt.s32.totalorder %s536_s12, 3 }
   0x4   : > { %p139_p2 = pnand %p434_p0, %p138_p1 }
   0x5   : > { %s435_s14 = sshll.u32 (!%p139_p2), %s430_s13, 5 }
   0x6   : > { %142 = sbr.rel (%p139_p2) target bundleno = 55 (0x37), region = 32  ;;  %p163_p3 = scmp.lt.s32.totalorder (!%p139_p2), %s435_s14, 63 }
   0xb   : > { %s710_s14 = smov (!%p163_p3, %s435_s14), 63  ;;  %v577_v0 = vld [vmem:[%s706_s1] ss:$0 sm:$0xff] }
   0xc   : > { %s436_s15 = sshll.u32 %s710_s14, 2  ;;  %v585_v5 = vld [vmem:[%s707_s2] ss:$0 sm:$0xff]  ;;  %s438_s23 = sshll.u32 %s710_s14, 3 }
   0xd   : > { %s572_s18 = scalar_lea.vmem %s705_s0, %s436_s15  ;;  %s604_s26 = scalar_lea.vmem %s708_s3, %s438_s23 }
   0xe   : > { %v442_v1 = vld [vmem:[%s572_s18] sm:$0xff]   ;;  %v505_v2 = vld [vmem:[%s572_s18 + $0x8] sm:$0xff]   ;;  %v506_v3 = vld [vmem:[%s572_s18 + $0x10] sm:$0xff]  }
   0xf   : > { %v443_v4 = vunpack.c.l.bf16 %v442_v1  ;;  %v444_v6 = vunpack.c.h.bf16 %v442_v1  ;;  %v447_v7 = vunpack.c.l.bf16 %v505_v2  ;;  %v448_v8 = vunpack.c.h.bf16 %v505_v2  ;;  %v507_v9 = vld [vmem:[%s572_s18 + $0x18] sm:$0xff]   ;;  %v508_v30 = vld [vmem:[%s572_s18 + $0x20] sm:$0xff]   ;;  %v509_v31 = vld [vmem:[%s572_s18 + $0x28] sm:$0xff]  }
  0x10   : > { %v451_v10 = vunpack.c.l.bf16 %v506_v3  ;;  %v452_v11 = vunpack.c.h.bf16 %v506_v3  ;;  %v455_v12 = vunpack.c.l.bf16 %v507_v9  ;;  %v456_v13 = vunpack.c.h.bf16 %v507_v9  ;;  %v510_v36 = vld [vmem:[%s572_s18 + $0x30] sm:$0xff]   ;;  %v511_v37 = vld [vmem:[%s572_s18 + $0x38] sm:$0xff]   ;;  %v512_v3 = vld [vmem:[%s572_s18 + $0x40] sm:$0xff]  }
  0x11   : > { %v242_v14 = vmul.f32 %v577_v0, %v443_v4  ;;  %v243_v15 = vmul.f32 %v577_v0, %v444_v6  ;;  %v244_v16 = vmul.f32 %v577_v0, %v447_v7  ;;  %v245_v17 = vmul.f32 %v577_v0, %v448_v8  ;;  %v513_v4 = vld [vmem:[%s572_s18 + $0x48] sm:$0xff]   ;;  %v514_v6 = vld [vmem:[%s572_s18 + $0x50] sm:$0xff]  }
  0x12   : > { %v246_v18 = vmul.f32 %v577_v0, %v451_v10  ;;  %v247_v19 = vmul.f32 %v577_v0, %v452_v11  ;;  %v248_v20 = vmul.f32 %v577_v0, %v455_v12  ;;  %v249_v21 = vmul.f32 %v577_v0, %v456_v13  ;;  %v515_v11 = vld [vmem:[%s572_s18 + $0x58] sm:$0xff]  }
  0x13   : > { %v278_v22 = vadd.f32 %v585_v5, %v242_v14  ;;  %v279_v23 = vadd.f32 %v585_v5, %v243_v15  ;;  %v280_v24 = vadd.f32 %v585_v5, %v244_v16  ;;  %v281_v25 = vadd.f32 %v585_v5, %v245_v17 }
  0x14   : > { %v282_v26 = vadd.f32 %v585_v5, %v246_v18  ;;  %v283_v27 = vadd.f32 %v585_v5, %v247_v19  ;;  %v284_v28 = vadd.f32 %v585_v5, %v248_v20  ;;  %v285_v29 = vadd.f32 %v585_v5, %v249_v21 }
  0x15   : > { %v310_v32 = vmax.f32 %v278_v22, 0.0  ;;  %v311_v33 = vmax.f32 %v279_v23, 0.0  ;;  %v312_v34 = vmax.f32 %v280_v24, 0.0  ;;  %v313_v35 = vmax.f32 %v281_v25, 0.0 }
  0x16   : > { %v314_v38 = vmax.f32 %v282_v26, 0.0  ;;  %v315_v39 = vmax.f32 %v283_v27, 0.0  ;;  %v316_v40 = vmax.f32 %v284_v28, 0.0  ;;  %v317_v41 = vmax.f32 %v285_v29, 0.0 }
  0x17   : > { %342 = vst [vmem:[%s604_s26] sm:$0xff] %v310_v32  ;;  %v459_v42 = vunpack.c.l.bf16 %v508_v30  ;;  %v460_v43 = vunpack.c.h.bf16 %v508_v30  ;;  %v463_v44 = vunpack.c.l.bf16 %v509_v31  ;;  %v464_v45 = vunpack.c.h.bf16 %v509_v31 }
  0x18   : > { %343 = vst [vmem:[%s604_s26 + $0x8] sm:$0xff] %v311_v33  ;;  %v467_v46 = vunpack.c.l.bf16 %v510_v36  ;;  %v468_v47 = vunpack.c.h.bf16 %v510_v36  ;;  %v471_v48 = vunpack.c.l.bf16 %v511_v37  ;;  %v472_v49 = vunpack.c.h.bf16 %v511_v37 }
  0x19   : > { %344 = vst [vmem:[%s604_s26 + $0x10] sm:$0xff] %v312_v34  ;;  %v250_v50 = vmul.f32 %v577_v0, %v459_v42  ;;  %v251_v51 = vmul.f32 %v577_v0, %v460_v43  ;;  %v252_v52 = vmul.f32 %v577_v0, %v463_v44  ;;  %v253_v53 = vmul.f32 %v577_v0, %v464_v45  ;;  %v518_v42 = vld [vmem:[%s572_s18 + $0x70] sm:$0xff]  }
  0x1a   : > { %345 = vst [vmem:[%s604_s26 + $0x18] sm:$0xff] %v313_v35  ;;  %v254_v54 = vmul.f32 %v577_v0, %v467_v46  ;;  %v255_v55 = vmul.f32 %v577_v0, %v468_v47  ;;  %v256_v56 = vmul.f32 %v577_v0, %v471_v48  ;;  %v257_v57 = vmul.f32 %v577_v0, %v472_v49  ;;  %v519_v47 = vld [vmem:[%s572_s18 + $0x78] sm:$0xff]  }
  0x1b   : > { %346 = vst [vmem:[%s604_s26 + $0x20] sm:$0xff] %v314_v38  ;;  %v286_v58 = vadd.f32 %v585_v5, %v250_v50  ;;  %v287_v59 = vadd.f32 %v585_v5, %v251_v51  ;;  %v288_v60 = vadd.f32 %v585_v5, %v252_v52  ;;  %v289_v61 = vadd.f32 %v585_v5, %v253_v53 }
  0x1c   : > { %347 = vst [vmem:[%s604_s26 + $0x28] sm:$0xff] %v315_v39  ;;  %v290_v62 = vadd.f32 %v585_v5, %v254_v54  ;;  %v291_v63 = vadd.f32 %v585_v5, %v255_v55  ;;  %v292_v1 = vadd.f32 %v585_v5, %v256_v56  ;;  %v293_v2 = vadd.f32 %v585_v5, %v257_v57 }
  0x1d   : > { %348 = vst [vmem:[%s604_s26 + $0x30] sm:$0xff] %v316_v40  ;;  %v318_v7 = vmax.f32 %v286_v58, 0.0  ;;  %v319_v8 = vmax.f32 %v287_v59, 0.0  ;;  %v320_v9 = vmax.f32 %v288_v60, 0.0  ;;  %v321_v10 = vmax.f32 %v289_v61, 0.0  ;;  %v516_v40 = vld [vmem:[%s572_s18 + $0x60] sm:$0xff]  }
  0x1e   : > { %349 = vst [vmem:[%s604_s26 + $0x38] sm:$0xff] %v317_v41  ;;  %v322_v12 = vmax.f32 %v290_v62, 0.0  ;;  %v323_v13 = vmax.f32 %v291_v63, 0.0  ;;  %v324_v14 = vmax.f32 %v292_v1, 0.0  ;;  %v325_v15 = vmax.f32 %v293_v2, 0.0  ;;  %v517_v41 = vld [vmem:[%s572_s18 + $0x68] sm:$0xff]  }
  0x1f   : > { %350 = vst [vmem:[%s604_s26 + $0x40] sm:$0xff] %v318_v7  ;;  %v475_v16 = vunpack.c.l.bf16 %v512_v3  ;;  %v476_v17 = vunpack.c.h.bf16 %v512_v3  ;;  %v479_v18 = vunpack.c.l.bf16 %v513_v4  ;;  %v480_v19 = vunpack.c.h.bf16 %v513_v4 }
  0x20   : > { %351 = vst [vmem:[%s604_s26 + $0x48] sm:$0xff] %v319_v8  ;;  %v483_v20 = vunpack.c.l.bf16 %v514_v6  ;;  %v484_v21 = vunpack.c.h.bf16 %v514_v6  ;;  %v487_v22 = vunpack.c.l.bf16 %v515_v11  ;;  %v488_v23 = vunpack.c.h.bf16 %v515_v11 }
  0x21   : > { %352 = vst [vmem:[%s604_s26 + $0x50] sm:$0xff] %v320_v9  ;;  %v258_v24 = vmul.f32 %v577_v0, %v475_v16  ;;  %v259_v25 = vmul.f32 %v577_v0, %v476_v17  ;;  %v260_v26 = vmul.f32 %v577_v0, %v479_v18  ;;  %v261_v27 = vmul.f32 %v577_v0, %v480_v19 }
  0x22   : > { %353 = vst [vmem:[%s604_s26 + $0x58] sm:$0xff] %v321_v10  ;;  %v262_v28 = vmul.f32 %v577_v0, %v483_v20  ;;  %v263_v29 = vmul.f32 %v577_v0, %v484_v21  ;;  %v264_v30 = vmul.f32 %v577_v0, %v487_v22  ;;  %v265_v31 = vmul.f32 %v577_v0, %v488_v23 }
  0x23   : > { %354 = vst [vmem:[%s604_s26 + $0x60] sm:$0xff] %v322_v12  ;;  %v294_v32 = vadd.f32 %v585_v5, %v258_v24  ;;  %v295_v33 = vadd.f32 %v585_v5, %v259_v25  ;;  %v296_v34 = vadd.f32 %v585_v5, %v260_v26  ;;  %v297_v35 = vadd.f32 %v585_v5, %v261_v27 }
  0x24   : > { %355 = vst [vmem:[%s604_s26 + $0x68] sm:$0xff] %v323_v13  ;;  %v298_v36 = vadd.f32 %v585_v5, %v262_v28  ;;  %v299_v37 = vadd.f32 %v585_v5, %v263_v29  ;;  %v300_v38 = vadd.f32 %v585_v5, %v264_v30  ;;  %v301_v39 = vadd.f32 %v585_v5, %v265_v31 }
  0x25   : > { %356 = vst [vmem:[%s604_s26 + $0x70] sm:$0xff] %v324_v14  ;;  %v326_v43 = vmax.f32 %v294_v32, 0.0  ;;  %v327_v44 = vmax.f32 %v295_v33, 0.0  ;;  %v328_v45 = vmax.f32 %v296_v34, 0.0  ;;  %v329_v46 = vmax.f32 %v297_v35, 0.0 }
  0x26   : > { %357 = vst [vmem:[%s604_s26 + $0x78] sm:$0xff] %v325_v15  ;;  %v330_v48 = vmax.f32 %v298_v36, 0.0  ;;  %v331_v49 = vmax.f32 %v299_v37, 0.0  ;;  %v332_v50 = vmax.f32 %v300_v38, 0.0  ;;  %v333_v51 = vmax.f32 %v301_v39, 0.0 }
  0x27   : > { %358 = vst [vmem:[%s604_s26 + $0x80] sm:$0xff] %v326_v43  ;;  %v491_v52 = vunpack.c.l.bf16 %v516_v40  ;;  %v492_v53 = vunpack.c.h.bf16 %v516_v40  ;;  %v495_v54 = vunpack.c.l.bf16 %v517_v41  ;;  %v496_v55 = vunpack.c.h.bf16 %v517_v41 }
  0x28   : > { %359 = vst [vmem:[%s604_s26 + $0x88] sm:$0xff] %v327_v44  ;;  %v499_v56 = vunpack.c.l.bf16 %v518_v42  ;;  %v500_v57 = vunpack.c.h.bf16 %v518_v42  ;;  %v503_v58 = vunpack.c.l.bf16 %v519_v47  ;;  %v504_v59 = vunpack.c.h.bf16 %v519_v47 }
  0x29   : > { %360 = vst [vmem:[%s604_s26 + $0x90] sm:$0xff] %v328_v45  ;;  %v266_v60 = vmul.f32 %v577_v0, %v491_v52  ;;  %v267_v61 = vmul.f32 %v577_v0, %v492_v53  ;;  %v268_v62 = vmul.f32 %v577_v0, %v495_v54  ;;  %v269_v63 = vmul.f32 %v577_v0, %v496_v55 }
  0x2a   : > { %361 = vst [vmem:[%s604_s26 + $0x98] sm:$0xff] %v329_v46  ;;  %v270_v1 = vmul.f32 %v577_v0, %v499_v56  ;;  %v271_v2 = vmul.f32 %v577_v0, %v500_v57  ;;  %v272_v3 = vmul.f32 %v577_v0, %v503_v58  ;;  %v273_v4 = vmul.f32 %v577_v0, %v504_v59 }
  0x2b   : > { %362 = vst [vmem:[%s604_s26 + $0xa0] sm:$0xff] %v330_v48  ;;  %v302_v6 = vadd.f32 %v585_v5, %v266_v60  ;;  %v303_v7 = vadd.f32 %v585_v5, %v267_v61  ;;  %v304_v8 = vadd.f32 %v585_v5, %v268_v62  ;;  %v305_v9 = vadd.f32 %v585_v5, %v269_v63 }
  0x2c   : > { %363 = vst [vmem:[%s604_s26 + $0xa8] sm:$0xff] %v331_v49  ;;  %v306_v10 = vadd.f32 %v585_v5, %v270_v1  ;;  %v307_v11 = vadd.f32 %v585_v5, %v271_v2  ;;  %v308_v14 = vadd.f32 %v585_v5, %v272_v3  ;;  %v309_v16 = vadd.f32 %v585_v5, %v273_v4 }
  0x2d   : > { %364 = vst [vmem:[%s604_s26 + $0xb0] sm:$0xff] %v332_v50  ;;  %v334_v0 = vmax.f32 %v302_v6, 0.0  ;;  %v335_v12 = vmax.f32 %v303_v7, 0.0  ;;  %v336_v13 = vmax.f32 %v304_v8, 0.0  ;;  %v337_v15 = vmax.f32 %v305_v9, 0.0 }
  0x2e   : > { %365 = vst [vmem:[%s604_s26 + $0xb8] sm:$0xff] %v333_v51  ;;  %v338_v17 = vmax.f32 %v306_v10, 0.0  ;;  %v339_v18 = vmax.f32 %v307_v11, 0.0  ;;  %v340_v19 = vmax.f32 %v308_v14, 0.0  ;;  %v341_v20 = vmax.f32 %v309_v16, 0.0 }
  0x2f   : > { %366 = vst [vmem:[%s604_s26 + $0xc0] sm:$0xff] %v334_v0 }
  0x30   : > { %367 = vst [vmem:[%s604_s26 + $0xc8] sm:$0xff] %v335_v12 }
  0x31   : > { %368 = vst [vmem:[%s604_s26 + $0xd0] sm:$0xff] %v336_v13 }
  0x32   : > { %369 = vst [vmem:[%s604_s26 + $0xd8] sm:$0xff] %v337_v15 }
  0x33   : > { %370 = vst [vmem:[%s604_s26 + $0xe0] sm:$0xff] %v338_v17 }
  0x34   : > { %371 = vst [vmem:[%s604_s26 + $0xe8] sm:$0xff] %v339_v18 }
  0x35   : > { %372 = vst [vmem:[%s604_s26 + $0xf0] sm:$0xff] %v340_v19 }
  0x36   : > { %373 = vst [vmem:[%s604_s26 + $0xf8] sm:$0xff] %v341_v20 }
  0x37 PF: > { %s13_s12 = sadd.s32 1, %s536_s12  }
  0x38   : > { %p10_p4 = scmp.ge.s32.totalorder %s13_s12, 4  }
  0x3a   :  { %12 = sbr.rel (!%p10_p4) target bundleno = 1 (0x1), region = 62 }

// kernel: conv_bn_relu.2
= control target key start
LH: loop header
LB: loop body
LE: loop exit
PB: predicated region body
PF: predicated region fallthrough
CT: control target
= control target key end

     0   :  { %s1285_s12 = smov 0   ;;  %s1287_s13 = smov 0   ;;  %s1507_s0 = inlined_call_operand.vmem [shape: bf16[512,128], index: 0, kind: input, shape index: {}]   ;;  %s1508_s1 = inlined_call_operand.vmem [shape: bf16[128,128], index: 1, kind: input, shape index: {}]   ;;  %s1509_s2 = inlined_call_operand.vmem [shape: bf16[512,128], index: 2, kind: output, shape index: {0}]   ;;  %s1510_s3 = inlined_call_operand.vmem [shape: f32[2,2,128], index: 3, kind: output, shape index: {1}]  }
   0x1   :  { %s1289_s14 = smov 0  }
   0x2 LB: > { %s26_s15 = sadd.s32 1, %s1259_s13  ;;  %p970_p0 = scmp.ge.s32.totalorder %s1263_s14, 1  ;;  %s1263_s14 = sphi %s1289_s14, %s14_s14   ;;  %s1259_s13 = sphi %s1287_s13, %s1512_s13   ;;  %s1255_s12 = sphi %s1285_s12, %s1511_s12  }
   0x3   : > { %p28_p1 = scmp.ge.s32.totalorder %s26_s15, 2  ;;  %p169_p2 = scmp.lt.s32.totalorder %s1263_s14, 3 }
   0x5   : > { %s1514_s15 = smov (%p28_p1, %s26_s15), 0  ;;  %p170_p3 = pnand %p970_p0, %p169_p2 }
   0x6   : > { %s971_s24 = sshll.u32 (!%p170_p3), %s1255_s12, 5  ;;  %p226_p5 = scmp.lt.s32.totalorder (!%p170_p3), %s1255_s12, 1 }
   0x7   : > { %173 = sbr.rel (%p170_p3) target bundleno = 292 (0x124), region = 28  ;;  %p206_p4 = scmp.lt.s32.totalorder (!%p170_p3), %s971_s24, 63 }
   0xc   : > { %v1097_v0 = vld [vmem:[%s1508_s1 + $0x38] sm:$0xff]  ;;  %v1096_v1 = vld [vmem:[%s1508_s1 + $0x30] sm:$0xff]  ;;  %v1095_v2 = vld [vmem:[%s1508_s1 + $0x28] sm:$0xff]  ;;  %s1516_s24 = smov (!%p206_p4, %s971_s24), 63  ;;  %s1518_s12 = smov (!%p226_p5, %s1255_s12), 1  ;;  %vm848_vm0 = vcmask 1040384  }
   0xd   : > { %490 = vmatpush.bf16.msra.mxu0 %v1097_v0  ;;  %1193 = vmatpush.bf16.msra.mxu1 %v1097_v0  ;;  %v1094_v3 = vld [vmem:[%s1508_s1 + $0x20] sm:$0xff]  ;;  %v1093_v4 = vld [vmem:[%s1508_s1 + $0x18] sm:$0xff]  ;;  %v1092_v5 = vld [vmem:[%s1508_s1 + $0x10] sm:$0xff]  ;;  %s972_s4 = sshll.u32 %s1516_s24, 2  ;;  %s975_s17 = sshll.u32 %s1518_s12, 1 }
   0xe   : > { %1194 = vmatpush.bf16.msra.mxu2 %v1097_v0  ;;  %1195 = vmatpush.bf16.msra.mxu3 %v1097_v0  ;;  %v1091_v6 = vld [vmem:[%s1508_s1 + $0x8] sm:$0xff]  ;;  %v1090_v7 = vld [vmem:[%s1508_s1] sm:$0xff]  ;;  %s1338_s9 = scalar_lea.vmem %s1507_s0, %s972_s4  ;;  %s1365_s16 = scalar_lea.vmem %s1509_s2, %s972_s4 }
   0xf   : > { %v1074_v8 = vld [vmem:[%s1338_s9] sm:$0xff]  ;;  %v1075_v12 = vld [vmem:[%s1338_s9 + $0x8] sm:$0xff]  ;;  %v1076_v16 = vld [vmem:[%s1338_s9 + $0x10] sm:$0xff]  ;;  %s229_s20 = scalar_lea.vmem %s1510_s3, %s975_s17 }
  0x10   : > { %v1078_v9 = vld [vmem:[%s1338_s9 + $0x20] sm:$0xff]  ;;  %v1079_v13 = vld [vmem:[%s1338_s9 + $0x28] sm:$0xff]  ;;  %v1080_v17 = vld [vmem:[%s1338_s9 + $0x30] sm:$0xff] }
  0x11   : > { %491 = vmatpush.bf16.msra.mxu0 %v1096_v1  ;;  %1196 = vmatpush.bf16.msra.mxu1 %v1096_v1  ;;  %v1082_v10 = vld [vmem:[%s1338_s9 + $0x40] sm:$0xff]  ;;  %v1083_v14 = vld [vmem:[%s1338_s9 + $0x48] sm:$0xff]  ;;  %v1084_v18 = vld [vmem:[%s1338_s9 + $0x50] sm:$0xff] }
  0x12   : > { %1197 = vmatpush.bf16.msra.mxu2 %v1096_v1  ;;  %1198 = vmatpush.bf16.msra.mxu3 %v1096_v1  ;;  %v1086_v11 = vld [vmem:[%s1338_s9 + $0x60] sm:$0xff]  ;;  %v1087_v15 = vld [vmem:[%s1338_s9 + $0x68] sm:$0xff]  ;;  %v1088_v19 = vld [vmem:[%s1338_s9 + $0x70] sm:$0xff] }
  0x13   : > { %v1077_v20 = vld [vmem:[%s1338_s9 + $0x18] sm:$0xff] }
  0x14   : > { %v1081_v21 = vld [vmem:[%s1338_s9 + $0x38] sm:$0xff] }
  0x15   : > { %492 = vmatpush.bf16.msra.mxu0 %v1095_v2  ;;  %1199 = vmatpush.bf16.msra.mxu1 %v1095_v2  ;;  %v1085_v22 = vld [vmem:[%s1338_s9 + $0x58] sm:$0xff] }
  0x16   : > { %1200 = vmatpush.bf16.msra.mxu2 %v1095_v2  ;;  %1201 = vmatpush.bf16.msra.mxu3 %v1095_v2  ;;  %v1089_v23 = vld [vmem:[%s1338_s9 + $0x78] sm:$0xff] }
  0x19   : > { %493 = vmatpush.bf16.msra.mxu0 %v1094_v3  ;;  %1202 = vmatpush.bf16.msra.mxu1 %v1094_v3 }
  0x1a   : > { %1203 = vmatpush.bf16.msra.mxu2 %v1094_v3  ;;  %1204 = vmatpush.bf16.msra.mxu3 %v1094_v3 }
  0x1d   : > { %494 = vmatpush.bf16.msra.mxu0 %v1093_v4  ;;  %1205 = vmatpush.bf16.msra.mxu1 %v1093_v4 }
  0x1e   : > { %1206 = vmatpush.bf16.msra.mxu2 %v1093_v4  ;;  %1207 = vmatpush.bf16.msra.mxu3 %v1093_v4 }
  0x21   : > { %495 = vmatpush.bf16.msra.mxu0 %v1092_v5  ;;  %1208 = vmatpush.bf16.msra.mxu1 %v1092_v5 }
  0x22   : > { %1209 = vmatpush.bf16.msra.mxu2 %v1092_v5  ;;  %1210 = vmatpush.bf16.msra.mxu3 %v1092_v5 }
  0x25   : > { %496 = vmatpush.bf16.msra.mxu0 %v1091_v6  ;;  %1211 = vmatpush.bf16.msra.mxu1 %v1091_v6 }
  0x26   : > { %1212 = vmatpush.bf16.msra.mxu2 %v1091_v6  ;;  %1213 = vmatpush.bf16.msra.mxu3 %v1091_v6 }
  0x29   : > { %497 = vmatpush.bf16.msra.mxu0 %v1090_v7  ;;  %1214 = vmatpush.bf16.msra.mxu1 %v1090_v7 }
  0x2a   : > { %1215 = vmatpush.bf16.msra.mxu2 %v1090_v7  ;;  %1216 = vmatpush.bf16.msra.mxu3 %v1090_v7 }
  0x2c   : > { %498 = vmatmul.bf16.vlgmr.msra.gmra.mxu0 %v1074_v8  ;;  %518 = vmatmul.bf16.vlgmr.msra.gmra.mxu1 %v1078_v9 }
  0x2d   : > { %538 = vmatmul.bf16.vlgmr.msra.gmra.mxu2 %v1082_v10  ;;  %558 = vmatmul.bf16.vlgmr.msra.gmra.mxu3 %v1086_v11 }
  0x3c   : > { %503 = vmatmul.bf16.gmra.mxu0 %v1075_v12  ;;  %523 = vmatmul.bf16.gmra.mxu1 %v1079_v13 }
  0x3d   : > { %543 = vmatmul.bf16.gmra.mxu2 %v1083_v14  ;;  %563 = vmatmul.bf16.gmra.mxu3 %v1087_v15 }
  0x4c   : > { %508 = vmatmul.bf16.gmra.mxu0 %v1076_v16  ;;  %528 = vmatmul.bf16.gmra.mxu1 %v1080_v17 }
  0x4d   : > { %548 = vmatmul.bf16.gmra.mxu2 %v1084_v18  ;;  %568 = vmatmul.bf16.gmra.mxu3 %v1088_v19 }
  0x5c   : > { %513 = vmatmul.bf16.gmra.mxu0 %v1077_v20  ;;  %533 = vmatmul.bf16.gmra.mxu1 %v1081_v21 }
  0x5d   : > { %553 = vmatmul.bf16.gmra.mxu2 %v1085_v22  ;;  %573 = vmatmul.bf16.gmra.mxu3 %v1089_v23 }
  0xa9   : > { %v499_v24 = vpop.f32.mrf.mxu0  ;;  %v1356_v25 = vpop.f32.mrf.mxu1 }
  0xaa   : > { %v779_v57 = vmul.f32 %v499_v24, %v499_v24 }
  0xb0   : > { %v1358_v26 = vpop.f32.mrf.mxu2  ;;  %v1371_v31 = vpop.f32.mrf.mxu3 }
  0xb1   : > { %v501_v27 = vpop.f32.mrf.mxu0  ;;  %v1367_v28 = vpop.f32.mrf.mxu1 }
  0xb2   : > { %v1101_v29 = vpack.c.bf16 %v501_v27, %v499_v24  ;;  %v1121_v30 = vpack.c.bf16 %v1367_v28, %v1356_v25  ;;  %v780_v56 = vmul.f32 %v501_v27, %v501_v27  ;;  %v742_v59 = vadd.f32 %v501_v27, %v499_v24 }
  0xb3   : > { %v787_v27 = vmul.f32 %v1356_v25, %v1356_v25 }
  0xb4   : > { %1102 = vst [vmem:[%s1365_s16] sm:$0xff] %v1101_v29   ;;  %v811_v60 = vadd.f32 %v780_v56, %v779_v57 }
  0xb5   : > { %1181 = vst [vmem:[%s1365_s16 + $0x20] sm:$0xff] %v1121_v30  }
  0xb8   : > { %v1375_v32 = vpop.f32.mrf.mxu2  ;;  %v1381_v36 = vpop.f32.mrf.mxu3 }
  0xb9   : > { %v504_v33 = vpop.f32.mrf.mxu0  ;;  %v1377_v34 = vpop.f32.mrf.mxu1  ;;  %v1141_v35 = vpack.c.bf16 %v1375_v32, %v1358_v26  ;;  %v1161_v37 = vpack.c.bf16 %v1381_v36, %v1371_v31 }
  0xba   : > { %v781_v58 = vmul.f32 %v504_v33, %v504_v33  ;;  %v743_v62 = vadd.f32 %v742_v59, %v504_v33 }
  0xbb   : > { %1185 = vst [vmem:[%s1365_s16 + $0x40] sm:$0xff] %v1141_v35  }
  0xbc   : > { %1189 = vst [vmem:[%s1365_s16 + $0x60] sm:$0xff] %v1161_v37   ;;  %v812_v0 = vadd.f32 %v811_v60, %v781_v58 }
  0xc0   : > { %v1387_v38 = vpop.f32.mrf.mxu2  ;;  %v1393_v43 = vpop.f32.mrf.mxu3 }
  0xc1   : > { %v506_v39 = vpop.f32.mrf.mxu0  ;;  %v1389_v40 = vpop.f32.mrf.mxu1 }
  0xc2   : > { %v1106_v41 = vpack.c.bf16 %v506_v39, %v504_v33  ;;  %v1126_v42 = vpack.c.bf16 %v1389_v40, %v1377_v34  ;;  %v782_v61 = vmul.f32 %v506_v39, %v506_v39  ;;  %v744_v5 = vadd.f32 %v743_v62, %v506_v39 }
  0xc3   : > { %v788_v33 = vmul.f32 %v1367_v28, %v1367_v28  ;;  %v789_v39 = vmul.f32 %v1377_v34, %v1377_v34 }
  0xc4   : > { %1178 = vst [vmem:[%s1365_s16 + $0x8] sm:$0xff] %v1106_v41   ;;  %v813_v7 = vadd.f32 %v812_v0, %v782_v61 }
  0xc5   : > { %1182 = vst [vmem:[%s1365_s16 + $0x28] sm:$0xff] %v1126_v42  }
  0xc8   : > { %v1397_v44 = vpop.f32.mrf.mxu2  ;;  %v1403_v48 = vpop.f32.mrf.mxu3 }
  0xc9   : > { %v509_v45 = vpop.f32.mrf.mxu0  ;;  %v1399_v46 = vpop.f32.mrf.mxu1  ;;  %v1146_v47 = vpack.c.bf16 %v1397_v44, %v1387_v38  ;;  %v1166_v49 = vpack.c.bf16 %v1403_v48, %v1393_v43 }
  0xca   : > { %v783_v1 = vmul.f32 %v509_v45, %v509_v45  ;;  %v745_v10 = vadd.f32 %v744_v5, %v509_v45  ;;  %v796_v5 = vmul.f32 %v1375_v32, %v1375_v32 }
  0xcb   : > { %1186 = vst [vmem:[%s1365_s16 + $0x48] sm:$0xff] %v1146_v47  }
  0xcc   : > { %1190 = vst [vmem:[%s1365_s16 + $0x68] sm:$0xff] %v1166_v49   ;;  %v814_v11 = vadd.f32 %v813_v7, %v783_v1 }
  0xd0   : > { %v1409_v50 = vpop.f32.mrf.mxu2  ;;  %v1415_v55 = vpop.f32.mrf.mxu3 }
  0xd1   : > { %v511_v51 = vpop.f32.mrf.mxu0  ;;  %v1411_v52 = vpop.f32.mrf.mxu1 }
  0xd2   : > { %v1111_v53 = vpack.c.bf16 %v511_v51, %v509_v45  ;;  %v1131_v54 = vpack.c.bf16 %v1411_v52, %v1399_v46  ;;  %v784_v8 = vmul.f32 %v511_v51, %v511_v51  ;;  %v746_v13 = vadd.f32 %v745_v10, %v511_v51 }
  0xd3   : > { %v798_v10 = vmul.f32 %v1397_v44, %v1397_v44 }
  0xd4   : > { %1179 = vst [vmem:[%s1365_s16 + $0x10] sm:$0xff] %v1111_v53   ;;  %v815_v14 = vadd.f32 %v814_v11, %v784_v8 }
  0xd5   : > { %1183 = vst [vmem:[%s1365_s16 + $0x30] sm:$0xff] %v1131_v54   ;;  %v791_v54 = vmul.f32 %v1399_v46, %v1399_v46 }
  0xd8   : > { %v1419_v63 = vpop.f32.mrf.mxu2  ;;  %v1423_v6 = vpop.f32.mrf.mxu3 }
  0xd9   : > { %v514_v2 = vpop.f32.mrf.mxu0  ;;  %v534_v3 = vpop.f32.mrf.mxu1  ;;  %v1151_v4 = vpack.c.bf16 %v1419_v63, %v1409_v50  ;;  %v1171_v9 = vpack.c.bf16 %v1423_v6, %v1415_v55 }
  0xda   : > { %v785_v12 = vmul.f32 %v514_v2, %v514_v2  ;;  %v747_v15 = vadd.f32 %v746_v13, %v514_v2  ;;  %v793_v61 = vmul.f32 %v534_v3, %v534_v3 }
  0xdb   : > { %1187 = vst [vmem:[%s1365_s16 + $0x50] sm:$0xff] %v1151_v4  }
  0xdc   : > { %1191 = vst [vmem:[%s1365_s16 + $0x70] sm:$0xff] %v1171_v9   ;;  %v816_v17 = vadd.f32 %v815_v14, %v785_v12 }
  0xe0   : > { %v554_v16 = vpop.f32.mrf.mxu2  ;;  %v1429_v24 = vpop.f32.mrf.mxu3 }
  0xe1   : > { %v516_v18 = vpop.f32.mrf.mxu0  ;;  %v536_v19 = vpop.f32.mrf.mxu1 }
  0xe2   : > { %v1116_v20 = vpack.c.bf16 %v516_v18, %v514_v2  ;;  %v748_v21 = vadd.f32 %v747_v15, %v516_v18  ;;  %v786_v22 = vmul.f32 %v516_v18, %v516_v18  ;;  %v1136_v23 = vpack.c.bf16 %v536_v19, %v534_v3 }
  0xe3   : > { %v794_v1 = vmul.f32 %v536_v19, %v536_v19  ;;  %v795_v2 = vmul.f32 %v1358_v26, %v1358_v26  ;;  %v800_v15 = vmul.f32 %v1419_v63, %v1419_v63 }
  0xe4   : > { %1180 = vst [vmem:[%s1365_s16 + $0x18] sm:$0xff] %v1116_v20   ;;  %v749_v29 = vadd.f32 %v748_v21, %v1356_v25  ;;  %v817_v30 = vadd.f32 %v816_v17, %v786_v22  ;;  %v790_v25 = vmul.f32 %v1389_v40, %v1389_v40 }
  0xe5   : > { %1184 = vst [vmem:[%s1365_s16 + $0x38] sm:$0xff] %v1136_v23  }
  0xe6   : > { %v750_v35 = vadd.f32 %v749_v29, %v1367_v28  ;;  %v818_v37 = vadd.f32 %v817_v30, %v787_v27 }
  0xe8   : > { %v751_v41 = vadd.f32 %v750_v35, %v1377_v34  ;;  %v819_v42 = vadd.f32 %v818_v37, %v788_v33  ;;  %v556_v45 = vpop.f32.mrf.mxu2  ;;  %v576_v53 = vpop.f32.mrf.mxu3  ;;  %v792_v34 = vmul.f32 %v1411_v52, %v1411_v52  ;;  %v806_v35 = vmul.f32 %v1403_v48, %v1403_v48 }
  0xe9   : > { %v1156_v47 = vpack.c.bf16 %v556_v45, %v554_v16  ;;  %v1176_v28 = vpack.c.bf16 %v576_v53, %v1429_v24  ;;  %v802_v22 = vmul.f32 %v556_v45, %v556_v45 }
  0xea   : > { %v820_v49 = vadd.f32 %v819_v42, %v789_v39  ;;  %v752_v51 = vadd.f32 %v751_v41, %v1389_v40  ;;  %v807_v39 = vmul.f32 %v1415_v55, %v1415_v55 }
  0xeb   : > { %1188 = vst [vmem:[%s1365_s16 + $0x58] sm:$0xff] %v1156_v47  }
  0xec   : > { %v753_v56 = vadd.f32 %v752_v51, %v1399_v46  ;;  %v821_v57 = vadd.f32 %v820_v49, %v790_v25  ;;  %1192 = vst [vmem:[%s1365_s16 + $0x78] sm:$0xff] %v1176_v28   ;;  %v809_v49 = vmul.f32 %v1429_v24, %v1429_v24  ;;  %v810_v28 = vmul.f32 %v576_v53, %v576_v53 }
  0xee   : > { %v754_v58 = vadd.f32 %v753_v56, %v1411_v52  ;;  %v822_v59 = vadd.f32 %v821_v57, %v791_v54  ;;  %v797_v52 = vmul.f32 %v1387_v38, %v1387_v38 }
  0xf0   : > { %v755_v60 = vadd.f32 %v754_v58, %v534_v3  ;;  %v823_v40 = vadd.f32 %v822_v59, %v792_v34 }
  0xf2   : > { %v824_v62 = vadd.f32 %v823_v40, %v793_v61  ;;  %v756_v0 = vadd.f32 %v755_v60, %v536_v19  ;;  %v801_v19 = vmul.f32 %v554_v16, %v554_v16 }
  0xf4   : > { %v757_v4 = vadd.f32 %v756_v0, %v1358_v26  ;;  %v825_v46 = vadd.f32 %v824_v62, %v794_v1  ;;  %v799_v26 = vmul.f32 %v1409_v50, %v1409_v50 }
  0xf6   : > { %v758_v7 = vadd.f32 %v757_v4, %v1375_v32  ;;  %v826_v8 = vadd.f32 %v825_v46, %v795_v2 }
  0xf8   : > { %v759_v3 = vadd.f32 %v758_v7, %v1387_v38  ;;  %v827_v9 = vadd.f32 %v826_v8, %v796_v5 }
  0xfa   : > { %v828_v11 = vadd.f32 %v827_v9, %v797_v52  ;;  %v760_v12 = vadd.f32 %v759_v3, %v1397_v44  ;;  %v803_v44 = vmul.f32 %v1371_v31, %v1371_v31 }
  0xfc   : > { %v761_v13 = vadd.f32 %v760_v12, %v1409_v50  ;;  %v829_v14 = vadd.f32 %v828_v11, %v798_v10  ;;  %v804_v50 = vmul.f32 %v1381_v36, %v1381_v36 }
  0xfe   : > { %v762_v32 = vadd.f32 %v761_v13, %v1419_v63  ;;  %v830_v17 = vadd.f32 %v829_v14, %v799_v26  ;;  %v805_v63 = vmul.f32 %v1393_v43, %v1393_v43 }
 0x100   : > { %v831_v38 = vadd.f32 %v830_v17, %v800_v15  ;;  %v763_v18 = vadd.f32 %v762_v32, %v554_v16 }
 0x102   : > { %v832_v20 = vadd.f32 %v831_v38, %v801_v19  ;;  %v764_v21 = vadd.f32 %v763_v18, %v556_v45 }
 0x104   : > { %v765_v23 = vadd.f32 %v764_v21, %v1371_v31  ;;  %v833_v27 = vadd.f32 %v832_v20, %v802_v22 }
 0x106   : > { %v766_v29 = vadd.f32 %v765_v23, %v1381_v36  ;;  %v834_v30 = vadd.f32 %v833_v27, %v803_v44 }
 0x108   : > { %v767_v16 = vadd.f32 %v766_v29, %v1393_v43  ;;  %v835_v33 = vadd.f32 %v834_v30, %v804_v50  ;;  %v808_v43 = vmul.f32 %v1423_v6, %v1423_v6 }
 0x10a   : > { %v836_v37 = vadd.f32 %v835_v33, %v805_v63  ;;  %v768_v31 = vadd.f32 %v767_v16, %v1403_v48 }
 0x10c   : > { %v769_v41 = vadd.f32 %v768_v31, %v1415_v55  ;;  %v837_v36 = vadd.f32 %v836_v37, %v806_v35 }
 0x10e   : > { %v770_v42 = vadd.f32 %v769_v41, %v1423_v6  ;;  %v838_v45 = vadd.f32 %v837_v36, %v807_v39 }
 0x110   : > { %v839_v47 = vadd.f32 %v838_v45, %v808_v43  ;;  %v771_v25 = vadd.f32 %v770_v42, %v1429_v24 }
 0x112   : > { %v840_v48 = vadd.f32 %v839_v47, %v809_v49  ;;  %v772_v51 = vadd.f32 %v771_v25, %v576_v53 }
 0x114   : > { %v773_v54 = vrot.slane %v772_v51, 4  ;;  %v841_v56 = vadd.f32 %v840_v48, %v810_v28 }
 0x116   : > { %v774_v55 = vadd.f32 %v773_v54, %v772_v51  ;;  %v842_v57 = vrot.slane %v841_v56, 4 }
 0x118   : > { %v775_v34 = vrot.slane %v774_v55, 2  ;;  %v843_v58 = vadd.f32 %v842_v57, %v841_v56 }
 0x11a   : > { %v776_v59 = vadd.f32 %v775_v34, %v774_v55  ;;  %v844_v6 = vrot.slane %v843_v58, 2 }
 0x11c   : > { %v777_v60 = vrot.slane %v776_v59, 1  ;;  %v845_v61 = vadd.f32 %v844_v6, %v843_v58 }
 0x11e   : > { %v846_v40 = vrot.slane %v845_v61, 1  ;;  %v778_v24 = vadd.f32 %v777_v60, %v776_v59 }
 0x120   : > { %v847_v53 = vadd.f32 %v846_v40, %v845_v61 }
 0x122   : > { %v849_v62 = vsel %vm848_vm0, %v778_v24, %v847_v53 }
 0x123   : > { %850 = vst [vmem:[%s229_s20] sm:$0x3] %v849_v62 }
 0x124 PF: > { %s14_s14 = sadd.s32 1, %s1263_s14   ;;  %s1511_s12 = smov %s1259_s13 }
 0x125   : > { %p11_p6 = scmp.ge.s32.totalorder %s14_s14, 4   ;;  %s1512_s13 = smov %s1514_s15 }
 0x127   :  { %13 = sbr.rel (!%p11_p6) target bundleno = 2 (0x2), region = 81 }

</bundles_post_ra>
